<compile_context>
chip_gen: v5e
topology: v5e:2x2
jax: 0.10.0
libtpu: 0.0.40
codegen_flags: <defaults>
</compile_context>

<pallas_src>
import functools

import jax
import jax.numpy as jnp
from jax import lax
from jax.experimental import pallas as pl
from jax.experimental.pallas import tpu as pltpu

STATE_SIZE = 16          # state_size in the PyTorch module
HIDDEN = 128             # hidden channels of the 1x1 conv stack

# Sobel-x kernel from the module; sobel_y = sobel_x.T
SOBEL_X = ((-1.0, 0.0, 1.0),
           (-2.0, 0.0, 2.0),
           (-1.0, 0.0, 1.0))


def update_net_kernel(xf_ref, w1f_ref, w2t_ref, o_ref, *, H, W):
    """One batch element per grid step (everything channel-major / lane = spatial).

    xf_ref  : (1, C, Lp)   zero-padded image, flattened row-major over the padded
                           plane; Lp = (H+3)*(W+2) (1 top / 2 bottom pad rows,
                           1 left / 1 right pad cols — the extra bottom row keeps
                           every tap's flat view in bounds).
    w1f_ref : (128, 9*C)   first 1x1 conv with identity/Sobel taps folded in,
                           transposed; column t*C+c is tap t = di*3+dj, channel c.
    w2t_ref : (C, 128)     second 1x1 conv, transposed.
    o_ref   : (1, C, N)    N = H*(W+2). Column i*(W+2)+j is output pixel (i,j) for
                           j < W; the 2 trailing columns per row are junk and are
                           stripped by the wrapper.
    """
    Wp = W + 2
    N = H * Wp

    xf = xf_ref[0]                                   # (C, Lp)

    # im2col: the 9 taps are contiguous, statically-shifted flat views
    # (lane-axis shifts only — no per-tap reshape copies).
    parts = []
    for di in range(3):
        for dj in range(3):
            off = di * Wp + dj
            parts.append(xf[:, off:off + N])         # (C, N)
    cols = jnp.concatenate(parts, axis=0)            # (9C, N)

    # Layer 1 (identity + Sobel-x + Sobel-y + concat all folded into the weight):
    # a single K=144 MXU matmul with M=128 and lane-dense N.
    h = jnp.dot(w1f_ref[...], cols, preferred_element_type=jnp.float32)      # (128, N)
    h = jnp.maximum(h, 0.0)                                                   # ReLU
    # Layer 2: result is already channel-major (NCHW-flat) -> lane-dense store.
    o_ref[0] = jnp.dot(w2t_ref[...], h, preferred_element_type=jnp.float32)  # (C, N)


def update_net_forward(x_nchw, w1, w2):
    """x_nchw: (B, C, H, W) — PyTorch layout. Returns (B, C, H, W) float32.

    w1: (3C, 128)  first 1x1 conv  (w1[i, o] = torch_w1[o, i, 0, 0])
    w2: (128, C)   second 1x1 conv (w2[i, o] = torch_w2[o, i, 0, 0])
    """
    B, C, H, W = x_nchw.shape
    assert C == STATE_SIZE

    x = x_nchw.astype(jnp.float32)

    # Zero-pad (padding=1); one extra zero row at the bottom keeps every tap's
    # flat view in bounds. Flattening the padded plane is a free reshape.
    Wp = W + 2
    Lp = (H + 3) * Wp
    xp = jnp.pad(x, ((0, 0), (0, 0), (1, 2), (1, 1)))        # (B, C, H+3, W+2)
    xf = xp.reshape(B, C, Lp)

    # Fold identity + Sobel-x + Sobel-y taps into the first 1x1-conv weight.
    sx = jnp.array(SOBEL_X, jnp.float32)                      # (3, 3)
    sy = sx.T
    delta = jnp.zeros((3, 3), jnp.float32).at[1, 1].set(1.0)
    w_id, w_gx, w_gy = w1[:C], w1[C:2 * C], w1[2 * C:3 * C]   # (C, 128) each
    w1f = (delta[:, :, None, None] * w_id[None, None]
           + sx[:, :, None, None] * w_gx[None, None]
           + sy[:, :, None, None] * w_gy[None, None])         # (3, 3, C, 128)
    w1f = w1f.reshape(9 * C, HIDDEN).T                         # (128, 9C)
    w2t = w2.T                                                 # (C, 128)

    N = H * Wp
    kernel = functools.partial(update_net_kernel, H=H, W=W)

    # TODO(synk): for very large images (H*W on the order of 256^2+) add an
    # H-tile grid axis with a 2-row halo so per-step VMEM stays inside the v7x
    # 64 MiB limit and both v7x TensorCores get work when B == 1.
    out_flat = pl.pallas_call(
        kernel,
        out_shape=jax.ShapeDtypeStruct((B, C, N), jnp.float32),
        grid_spec=pl.GridSpec(
            grid=(B,),
            in_specs=[
                pl.BlockSpec((1, C, Lp), lambda b: (b, 0, 0)),
                pl.BlockSpec((HIDDEN, 9 * C), lambda b: (0, 0)),   # weights stay resident
                pl.BlockSpec((C, HIDDEN), lambda b: (0, 0)),       # weights stay resident
            ],
            out_specs=pl.BlockSpec((1, C, N), lambda b: (b, 0, 0)),
        ),
        compiler_params=pltpu.CompilerParams(dimension_semantics=("parallel",)),
    )(xf, w1f, w2t)

    # Strip the 2 junk columns per row introduced by the flat-shift im2col.
    return out_flat.reshape(B, C, H, Wp)[:, :, :, :W]


def reference_forward(x_nchw, w1, w2):
    """Pure-JAX reference mirroring the PyTorch module (NCHW)."""
    C = STATE_SIZE
    sx = jnp.array(SOBEL_X, jnp.float32)
    sy = sx.T
    sobel_x = jnp.tile(sx[None, None], (C, 1, 1, 1))   # (C, 1, 3, 3), OIHW
    sobel_y = jnp.tile(sy[None, None], (C, 1, 1, 1))
    dn = lax.conv_dimension_numbers(x_nchw.shape, sobel_x.shape,
                                    ("NCHW", "OIHW", "NCHW"))
    gx = lax.conv_general_dilated(x_nchw, sobel_x, (1, 1), ((1, 1), (1, 1)),
                                  dimension_numbers=dn, feature_group_count=C)
    gy = lax.conv_general_dilated(x_nchw, sobel_y, (1, 1), ((1, 1), (1, 1)),
                                  dimension_numbers=dn, feature_group_count=C)
    feat = jnp.concatenate([x_nchw, gx, gy], axis=1)                    # (B, 3C, H, W)
    h = jnp.maximum(jnp.einsum("bchw,cd->bdhw", feat, w1), 0.0)
    return jnp.einsum("bdhw,de->behw", h, w2)


if __name__ == "__main__":
    B, C, H, W = 2, STATE_SIZE, 16, 16

    key = jax.random.PRNGKey(0)
    kx, k1, k2 = jax.random.split(key, 3)

    x = jax.random.normal(kx, (B, C, H, W), jnp.float32)

    # Deterministic parameter init. Shapes match the module:
    #   Conv2d(3C, 128, 1, bias=False).weight -> (128, 3C, 1, 1) ==> w1: (3C, 128)
    #   Conv2d(128, C, 1, bias=False).weight  -> (C, 128, 1, 1)  ==> w2: (128, C)
    # NOTE: the module zero-initializes out_conv; we use small random values here
    # so the kernel output is non-trivial and verifiable.
    w1 = jax.random.normal(k1, (3 * C, HIDDEN), jnp.float32) * (1.0 / (3 * C) ** 0.5)
    w2 = jax.random.normal(k2, (HIDDEN, STATE_SIZE), jnp.float32) * (1.0 / HIDDEN ** 0.5)

    out = jax.block_until_ready(update_net_forward(x, w1, w2))
    ref = jax.block_until_ready(reference_forward(x, w1, w2))

    assert out.shape == (B, STATE_SIZE, H, W)
    assert jnp.allclose(out, ref, atol=2e-4, rtol=2e-4), "mismatch vs reference"

    print("KERNEL_OK")
</pallas_src>

<mosaic_0001>
module attributes {stable_mosaic.version = 11 : i64} {
  func.func @update_net_kernel(%arg0: i32, %arg1: memref<1x16x342xf32, #tpu.memory_space<vmem>>, %arg2: memref<128x144xf32, #tpu.memory_space<vmem>>, %arg3: memref<16x128xf32, #tpu.memory_space<vmem>>, %arg4: memref<1x16x288xf32, #tpu.memory_space<vmem>>) attributes {dimension_semantics = [#tpu.dimension_semantics<parallel>], iteration_bounds = array<i64: 2>, scalar_prefetch = 0 : i64, scratch_operands = 0 : i64, tpu.core_type = #tpu.core_type<tc>, window_params = [{transform_indices = @transform_0, window_bounds = array<i64: 1, 16, 342>}, {pipeline_mode = #tpu.pipeline_mode<synchronous>, transform_indices = @transform_1, window_bounds = array<i64: 128, 144>}, {pipeline_mode = #tpu.pipeline_mode<synchronous>, transform_indices = @transform_2, window_bounds = array<i64: 16, 128>}, {transform_indices = @transform_3, window_bounds = array<i64: 1, 16, 288>}]} {
    %c0 = arith.constant 0 : index
    %c0_0 = arith.constant 0 : index
    %c0_1 = arith.constant 0 : index
    %0 = vector.load %arg1[%c0, %c0_0, %c0_1] : memref<1x16x342xf32, #tpu.memory_space<vmem>>, vector<1x16x342xf32>
    %1 = vector.shape_cast %0 : vector<1x16x342xf32> to vector<16x342xf32>
    %2 = vector.extract_strided_slice %1 {offsets = [0, 0], sizes = [16, 288], strides = [1, 1]} : vector<16x342xf32> to vector<16x288xf32>
    %3 = vector.extract_strided_slice %1 {offsets = [0, 1], sizes = [16, 288], strides = [1, 1]} : vector<16x342xf32> to vector<16x288xf32>
    %4 = vector.extract_strided_slice %1 {offsets = [0, 2], sizes = [16, 288], strides = [1, 1]} : vector<16x342xf32> to vector<16x288xf32>
    %5 = vector.extract_strided_slice %1 {offsets = [0, 18], sizes = [16, 288], strides = [1, 1]} : vector<16x342xf32> to vector<16x288xf32>
    %6 = vector.extract_strided_slice %1 {offsets = [0, 19], sizes = [16, 288], strides = [1, 1]} : vector<16x342xf32> to vector<16x288xf32>
    %7 = vector.extract_strided_slice %1 {offsets = [0, 20], sizes = [16, 288], strides = [1, 1]} : vector<16x342xf32> to vector<16x288xf32>
    %8 = vector.extract_strided_slice %1 {offsets = [0, 36], sizes = [16, 288], strides = [1, 1]} : vector<16x342xf32> to vector<16x288xf32>
    %9 = vector.extract_strided_slice %1 {offsets = [0, 37], sizes = [16, 288], strides = [1, 1]} : vector<16x342xf32> to vector<16x288xf32>
    %10 = vector.extract_strided_slice %1 {offsets = [0, 38], sizes = [16, 288], strides = [1, 1]} : vector<16x342xf32> to vector<16x288xf32>
    %11 = tpu.concatenate %2, %3, %4, %5, %6, %7, %8, %9, %10 in 0 : vector<16x288xf32>, vector<16x288xf32>, vector<16x288xf32>, vector<16x288xf32>, vector<16x288xf32>, vector<16x288xf32>, vector<16x288xf32>, vector<16x288xf32>, vector<16x288xf32> -> vector<144x288xf32>
    %c0_2 = arith.constant 0 : index
    %c0_3 = arith.constant 0 : index
    %12 = vector.load %arg2[%c0_2, %c0_3] : memref<128x144xf32, #tpu.memory_space<vmem>>, vector<128x144xf32>
    %cst = arith.constant dense<0.000000e+00> : vector<128x288xf32>
    %13 = tpu.matmul %12, %11, %cst {dimension_numbers = #tpu.dot_dimension_numbers<[1], [0], [0], [1], [0, 0, 1, 1], [], []>} : vector<128x144xf32>, vector<144x288xf32>, vector<128x288xf32> -> vector<128x288xf32>
    %cst_4 = arith.constant 0.000000e+00 : f32
    %14 = vector.broadcast %cst_4 : f32 to vector<128x288xf32>
    %15 = arith.maximumf %13, %14 : vector<128x288xf32>
    %c0_5 = arith.constant 0 : index
    %c0_6 = arith.constant 0 : index
    %16 = vector.load %arg3[%c0_5, %c0_6] : memref<16x128xf32, #tpu.memory_space<vmem>>, vector<16x128xf32>
    %cst_7 = arith.constant dense<0.000000e+00> : vector<16x288xf32>
    %17 = tpu.matmul %16, %15, %cst_7 {dimension_numbers = #tpu.dot_dimension_numbers<[1], [0], [0], [1], [0, 0, 1, 1], [], []>} : vector<16x128xf32>, vector<128x288xf32>, vector<16x288xf32> -> vector<16x288xf32>
    %c0_8 = arith.constant 0 : index
    %c0_9 = arith.constant 0 : index
    %c0_10 = arith.constant 0 : index
    %18 = vector.load %arg4[%c0_8, %c0_9, %c0_10] : memref<1x16x288xf32, #tpu.memory_space<vmem>>, vector<1x16x288xf32>
    %19 = vector.shape_cast %18 : vector<1x16x288xf32> to vector<16x288xf32>
    %20 = vector.shape_cast %17 : vector<16x288xf32> to vector<1x16x288xf32>
    tpu.vector_store %arg4[%c0_8, %c0_9, %c0_10], %20 {strides = array<i32>} : memref<1x16x288xf32, #tpu.memory_space<vmem>>, vector<1x16x288xf32>,
    return
  }
  func.func @transform_0(%arg0: i32) -> (i32, i32, i32) {
    %c0_i32 = arith.constant 0 : i32
    %c0_i32_0 = arith.constant 0 : i32
    %c0_i32_1 = arith.constant 0 : i32
    return %arg0, %c0_i32, %c0_i32_0 : i32, i32, i32
  }
  func.func @transform_1(%arg0: i32) -> (i32, i32) {
    %c0_i32 = arith.constant 0 : i32
    %c0_i32_0 = arith.constant 0 : i32
    %c0_i32_1 = arith.constant 0 : i32
    return %c0_i32, %c0_i32_0 : i32, i32
  }
  func.func @transform_2(%arg0: i32) -> (i32, i32) {
    %c0_i32 = arith.constant 0 : i32
    %c0_i32_0 = arith.constant 0 : i32
    %c0_i32_1 = arith.constant 0 : i32
    return %c0_i32, %c0_i32_0 : i32, i32
  }
  func.func @transform_3(%arg0: i32) -> (i32, i32, i32) {
    %c0_i32 = arith.constant 0 : i32
    %c0_i32_0 = arith.constant 0 : i32
    %c0_i32_1 = arith.constant 0 : i32
    return %arg0, %c0_i32, %c0_i32_0 : i32, i32, i32
  }
}

</mosaic_0001>

<bundles_post_ra>
// kernel: tpu_custom_call.1
= control target key start
LH: loop header
LB: loop body
LE: loop exit
PB: predicated region body
PF: predicated region fallthrough
CT: control target
= control target key end

     0   :  { %8 = vsyncpa [#allocation3], 0  ;;  %s1928_s0 = inlined_call_operand.vmem [shape: f32[2,16,342], index: 0, kind: input, shape index: {}]   ;;  %s1929_s1 = inlined_call_operand.vmem [shape: f32[128,144], index: 1, kind: input, shape index: {}]   ;;  %s1930_s2 = inlined_call_operand.vmem [shape: f32[16,128], index: 2, kind: input, shape index: {}]   ;;  %s1931_s3 = inlined_call_operand.hbm [shape: f32[2,16,288], index: 3, kind: output, shape index: {}]  }
   0x1   :  { %10 = vsyncpa [#allocation3 + $0x1], 0  ;;  %s1366_s12 = smov 0   ;;  %s1368_s13 = smov 0  }
   0x2   :  { %s1370_s14 = smov 0   ;;  %s1372_s15 = smov 0  }
   0x3 LB: > { %s1387_s16 = sadd.s32 4294967295, %s1334_s15   ;;  %s1040_s17 = sadd.s32 4294967294, %s1334_s15   ;;  %s1334_s15 = sphi %s1372_s15, %s1951_s15   ;;  %s1330_s14 = sphi %s1370_s14, %s1950_s14   ;;  %s1326_s13 = sphi %s1368_s13, %s1949_s13   ;;  %s1322_s12 = sphi %s1366_s12, %s1948_s12  }
   0x4   : > { %s1391_s18 = sadd.s32 1, %s1334_s15   ;;  %s91_s19 = sadd.s32 1, %s1330_s14 }
   0x5   : > { %s88_s20 = ssub.s32 %s1334_s15, %s1391_s18  ;;  %p101_p0 = scmp.ne.s32.totalorder %s1330_s14, %s1326_s13 }
   0x6   : > { %p89_p1 = scmp.eq.s32.totalorder %s88_s20, 0  ;;  %p102_p2 = scmp.eq.s32.totalorder %s1387_s16, 1 }
   0x7   : > { %p107_p3 = scmp.ne.s32.totalorder %s1326_s13, %s1322_s12  ;;  %p108_p4 = scmp.eq.s32.totalorder %s1040_s17, 1 }
   0x8   : > { %s1402_s21 = scalar_select %p89_p1, %s1330_s14, %s91_s19  }
   0x9   : > { %p1404_p5 = por %p102_p2, %p101_p0  ;;  %p1408_p6 = por %p108_p4, %p107_p3 }
   0xa   : > { %p1043_p7 = scmp.ge.s32.totalorder %s1334_s15, 1  ;;  %p140_p8 = scmp.lt.s32.totalorder %s1334_s15, 3 }
   0xc   : > { %p141_p9 = pnand %p1043_p7, %p140_p8 }
   0xe   : > { %144 = sbr.rel (%p141_p9) target bundleno = 671 (0x29f), region = 32 }
  0x13   : > { %p164_p10 = scmp.lt.s32.totalorder %s1387_s16, 1  ;;  %s1336_s29 = smov 90   ;;  %vm354_vm0 = vcmask 736256   ;;  %vm331_vm1 = vcmask 744448   ;;  %vm397_vm2 = vcmask 130048   ;;  %v1455_v37 = vld [vmem:[%s1929_s1 + $0x58] sm:$0xff] }
  0x14   : > { %s1337_s30 = smov 91   ;;  %s1338_s4 = smov 92   ;;  %vm308_vm3 = vcmask 752640   ;;  %v1469_v46 = vld [vmem:[%s1929_s1 + $0xb8] sm:$0xff]  ;;  %vm285_vm4 = vcmask 883712   ;;  %v1475_v51 = vld [vmem:[%s1929_s1 + $0x8] sm:$0xff] }
  0x15   : > { %s165_s24 = scalar_select %p164_p10, %s1387_s16, 1  ;;  %v1485_v60 = vld [vmem:[%s1929_s1 + $0x68] sm:$0xff]  ;;  %vm262_vm5 = vcmask 891904   ;;  %vm239_vm6 = vcmask 900096   ;;  %vm216_vm7 = vcmask 1031168   ;;  %vm193_vm8 = vcmask 1039360  }
  0x16   : > { %s1339_s5 = smov 108   ;;  %s1340_s6 = smov 109   ;;  %vm957_vm9 = vcmask 261120  }
  0x17   : > { %s1101_s25 = smul.u32 48, %s165_s24  ;;  %s1341_s7 = smov 110  }
  0x18   : > { %s1342_s8 = smov 126   ;;  %s1343_s9 = smov 127  }
  0x19   : > { %s168_s28 = scalar_lea.vmem %s1928_s0, %s1101_s25 }
  0x1a   : > { %v1419_v0 = vld [vmem:[%s168_s28 + $0x20] sm:$0xff]  ;;  %v1421_v1 = vld [vmem:[%s168_s28 + $0x28] sm:$0xff]  ;;  %v1427_v4 = vld [vmem:[%s168_s28 + $0x10] sm:$0xff] }
  0x1b   : > { %v1423_v2 = vld [vmem:[%s168_s28 + $0x8] sm:$0xff]  ;;  %v1152_v3 = vpack.i.bf16 %v1421_v1, %v1419_v0  ;;  %v1429_v5 = vld [vmem:[%s168_s28] sm:$0xff]  ;;  %v1431_v6 = vld [vmem:[%s168_s28 + $0x18] sm:$0xff]  ;;  %s1292_s28 = scalar_lea.hbm %s1931_s3, 96 }
  0x1c   : > { %v1172_v7 = vpack.i.bf16 %v1427_v4, %v1423_v2  ;;  %v1162_v8 = vpack.i.bf16 %v1429_v5, %v1431_v6 }
  0x1d   : > { %1153 = vrot.lane.b32.xlu0 %v1152_v3, %s1336_s29 }
  0x1e   : > { %1173 = vrot.lane.b32.xlu2 %v1172_v7, %s1337_s30  ;;  %1163 = vrot.lane.b32.xlu1 %v1162_v8, %s1336_s29 }
  0x25   : > { %1158 = vrot.lane.b32.xlu0 %v1172_v7, %s1336_s29 }
  0x26   : > { %1178 = vrot.lane.b32.xlu2 %v1152_v3, %s1338_s4  ;;  %1168 = vrot.lane.b32.xlu1 %v1152_v3, %s1337_s30 }
  0x2d   : > { %1183 = vrot.lane.b32.xlu0 %v1172_v7, %s1338_s4 }
  0x2e   : > { %1193 = vrot.lane.b32.xlu2 %v1172_v7, %s1339_s5  ;;  %1188 = vrot.lane.b32.xlu1 %v1152_v3, %s1339_s5 }
  0x35   : > { %1198 = vrot.lane.b32.xlu0 %v1152_v3, %s1340_s6 }
  0x36   : > { %1208 = vrot.lane.b32.xlu2 %v1162_v8, %s1337_s30  ;;  %1203 = vrot.lane.b32.xlu1 %v1172_v7, %s1340_s6 }
  0x3d   : > { %1213 = vrot.lane.b32.xlu0 %v1152_v3, %s1341_s7 }
  0x3e   : > { %1223 = vrot.lane.b32.xlu2 %v1162_v8, %s1338_s4  ;;  %1218 = vrot.lane.b32.xlu1 %v1172_v7, %s1341_s7 }
  0x45   : > { %1228 = vrot.lane.b32.xlu0 %v1152_v3, %s1342_s8 }
  0x46   : > { %1238 = vrot.lane.b32.xlu2 %v1162_v8, %s1339_s5  ;;  %1233 = vrot.lane.b32.xlu1 %v1172_v7, %s1342_s8 }
  0x4d   : > { %1243 = vrot.lane.b32.xlu0 %v1152_v3, %s1343_s9 }
  0x4e   : > { %1253 = vrot.lane.b32.xlu2 %v1162_v8, %s1340_s6  ;;  %1248 = vrot.lane.b32.xlu1 %v1172_v7, %s1343_s9  ;;  %s161_s6 = sand.u32 1, %s1326_s13  }
  0x4f   : > { %s963_s24 = scalar_lea.sflag [#allocation3], %s161_s6 }
  0x55   : > { %1258 = vrot.lane.b32.xlu0 %v1162_v8, %s1341_s7  ;;  %s1100_s7 = smul.u32 48, %s161_s6 }
  0x56   : > { %1263 = vrot.lane.b32.xlu1 %v1162_v8, %s1342_s8  ;;  %1268 = vrot.lane.b32.xlu2 %v1162_v8, %s1343_s9  ;;  %v1498_v8 = vld [vmem:[%s1929_s1 + $0xc8] sm:$0xff]  ;;  %s1102_s9 = smul.u32 48, %s1387_s16 }
  0x57   : > { %s163_s8 = scalar_lea.vmem [#allocation2], %s1100_s7 }
  0x58   : > { %s974_s17 = scalar_lea.hbm %s1931_s3, %s1102_s9  ;;  %s975_s19 = sshll.u32 %s163_s8, 4  ;;  %s976_s19 = int_to_ptr.vmem [resolvable:$true] %s975_s19 }
  0x59   : > { %s977_s20 = sshll.u32 %s974_s17, 4  ;;  %s978_s20 = int_to_ptr.hbm [resolvable:$true] %s977_s20 }
  0x5a   : > { %s1286_s25 = sshra.s32 %s978_s20, 4  ;;  %s1287_s25 = int_to_ptr.hbm [resolvable:$true] %s1286_s25 }
  0x5b   : > { %s1288_s26 = scalar_lea.hbm %s1287_s25, 48  ;;  %p1293_p0 = scmp.lt.s32.totalorder %s1287_s25, %s1931_s3 }
  0x5c   : > { %p1289_p11 = scmp.ne.s32.totalorder %s1287_s25, %s1288_s26  ;;  %p1294_p1 = scmp.lt.s32.totalorder %s1292_s28, %s1288_s26 }
  0x5e   : > { %p1290_p12 = pnand %p1289_p11, %p1404_p5  ;;  %p1295_p2 = por %p1294_p1, %p1293_p0 }
  0x60   : > { %p1291_p13 = pneg %p1290_p12 }
  0x62   : > { %p1296_p3 = pnand %p1295_p2, %p1291_p13 }
  0x78   : > { %v1174_v9 = vpop.permute.xlu2 %1173 }
  0x79   : > { %v1176_v20 = vunpack.i.h.bf16 %v1174_v9  ;;  %v1175_v21 = vunpack.i.l.bf16 %v1174_v9 }
  0x7b   : > { %v333_v40 = vsel %vm331_vm1, %v1175_v21, %v1176_v20 }
  0x80   : > { %v1437_v10 = vpop.permute.xlu2 %1178 }
  0x81   : > { %v1181_v29 = vunpack.i.h.bf16 %v1437_v10  ;;  %v1180_v30 = vunpack.i.l.bf16 %v1437_v10 }
  0x83   : > { %v312_v44 = vsel %vm308_vm3, %v1180_v30, %v1181_v29 }
  0x88   : > { %v1439_v11 = vpop.permute.xlu2 %1193 }
  0x89   : > { %v1195_v47 = vunpack.i.l.bf16 %v1439_v11  ;;  %v1196_v53 = vunpack.i.h.bf16 %v1439_v11 }
  0x8b   : > { %v287_v3 = vsel %vm285_vm4, %v1195_v47, %v1196_v53 }
  0x8f   : > { %v1154_v12 = vpop.permute.xlu0 %1153 }
  0x90   : > { %v1156_v13 = vunpack.i.h.bf16 %v1154_v12  ;;  %v1155_v14 = vunpack.i.l.bf16 %v1154_v12  ;;  %v1209_v15 = vpop.permute.xlu2 %1208  ;;  %v1164_v16 = vpop.permute.xlu1 %1163  ;;  %v1503_v12 = vld [vmem:[%s1929_s1 + $0x18] sm:$0xff] }
  0x91   : > { %v1165_v17 = vunpack.i.l.bf16 %v1164_v16  ;;  %v1210_v22 = vunpack.i.l.bf16 %v1209_v15  ;;  %v1166_v24 = vunpack.i.h.bf16 %v1164_v16  ;;  %v1211_v33 = vunpack.i.h.bf16 %v1209_v15 }
  0x92   : > { %v1442_v18 = vsel %vm354_vm0, %v1155_v14, %v1156_v13 }
  0x93   : > { %v357_v19 = vsel %vm354_vm0, %v1165_v17, %v1155_v14  ;;  %1098 = vmatpush.msra.mxu3 %v1442_v18  ;;  %v332_v42 = vsel %vm331_vm1, %v1211_v33, %v1175_v21  ;;  %v1546_v33 = vld [vmem:[%s1929_s1 + $0x88] sm:$0xff] }
  0x94   : > { %525 = vmatpush.msra.mxu1 %v357_v19  ;;  %1096 = vmatpush.msra.mxu2 %v357_v19 }
  0x97   : > { %v1159_v23 = vpop.permute.xlu0 %1158 }
  0x98   : > { %v1161_v25 = vunpack.i.h.bf16 %v1159_v23  ;;  %v1160_v26 = vunpack.i.l.bf16 %v1159_v23  ;;  %v1224_v27 = vpop.permute.xlu2 %1223  ;;  %v1169_v28 = vpop.permute.xlu1 %1168 }
  0x99   : > { %v1171_v31 = vunpack.i.h.bf16 %v1169_v28  ;;  %v1170_v32 = vunpack.i.l.bf16 %v1169_v28  ;;  %v1225_v34 = vunpack.i.l.bf16 %v1224_v27  ;;  %v1226_v41 = vunpack.i.h.bf16 %v1224_v27  ;;  %v1533_v28 = vld [vmem:[%s1929_s1 + $0x28] sm:$0xff] }
  0x9a   : > { %v355_v35 = vsel %vm354_vm0, %v1166_v24, %v1160_v26  ;;  %v1450_v36 = vsel %vm354_vm0, %v1160_v26, %v1161_v25 }
  0x9b   : > { %v334_v38 = vsel %vm331_vm1, %v1210_v22, %v1170_v32  ;;  %526 = vmatpush.msra.mxu1 %v355_v35  ;;  %1097 = vmatpush.msra.mxu2 %v355_v35  ;;  %v335_v39 = vsel %vm331_vm1, %v1170_v32, %v1171_v31  ;;  %v311_v43 = vsel %vm308_vm3, %v1225_v34, %v1180_v30 }
  0x9c   : > { %446 = vmatpush.msra.mxu0 %v334_v38  ;;  %1099 = vmatpush.msra.mxu3 %v1450_v36  ;;  %v1558_v38 = vld [vmem:[%s1929_s1 + $0xe8] sm:$0xff] }
  0x9d   : > { %576 = vmatpush.msrb.mxu2 %v335_v39  ;;  %1066 = vmatmul.msk.f32.vlgmr.msra.gmra.mxu3 %vm397_vm2, %v1455_v37 }
  0x9e   : > { %706 = vmatpush.msrb.mxu1 %v1171_v31  ;;  %785 = vmatpush.msrb.mxu3 %v1156_v13 }
  0x9f   : > { %447 = vmatpush.msra.mxu0 %v332_v42  ;;  %577 = vmatpush.msrb.mxu2 %v333_v40  ;;  %v1184_v45 = vpop.permute.xlu0 %1183 }
  0xa0   : > { %707 = vmatpush.msrb.mxu1 %v1176_v20  ;;  %786 = vmatpush.msrb.mxu3 %v1161_v25  ;;  %v1185_v48 = vunpack.i.l.bf16 %v1184_v45  ;;  %v1239_v49 = vpop.permute.xlu2 %1238  ;;  %v1189_v50 = vpop.permute.xlu1 %1188  ;;  %v1186_v52 = vunpack.i.h.bf16 %v1184_v45  ;;  %v1511_v20 = vld [vmem:[%s1929_s1 + $0x78] sm:$0xff] }
  0xa1   : > { %v1241_v54 = vunpack.i.h.bf16 %v1239_v49  ;;  %v1240_v55 = vunpack.i.l.bf16 %v1239_v49  ;;  %v1190_v56 = vunpack.i.l.bf16 %v1189_v50  ;;  %448 = vmatpush.msra.mxu0 %v311_v43  ;;  %578 = vmatpush.msrb.mxu2 %v312_v44  ;;  %v1191_v57 = vunpack.i.h.bf16 %v1189_v50  ;;  %v1525_v25 = vld [vmem:[%s1929_s1 + $0xd8] sm:$0xff] }
  0xa2   : > { %708 = vmatpush.msrb.mxu1 %v1181_v29  ;;  %1056 = vmatmul.msk.f32.vlgmr.msra.gmra.mxu2 %vm397_vm2, %v1469_v46  ;;  %v309_v58 = vsel %vm308_vm3, %v1226_v41, %v1185_v48  ;;  %v310_v59 = vsel %vm308_vm3, %v1185_v48, %v1186_v52  ;;  %v1563_v41 = vld [vmem:[%s1929_s1 + $0x38] sm:$0xff] }
  0xa3   : > { %1045 = vmatmul.msk.f32.vlgmr.msra.gmra.mxu1 %vm397_vm2, %v1475_v51  ;;  %449 = vmatpush.msra.mxu0 %v309_v58  ;;  %v288_v61 = vsel %vm285_vm4, %v1240_v55, %v1190_v56  ;;  %v289_v62 = vsel %vm285_vm4, %v1190_v56, %v1191_v57  ;;  %v286_v63 = vsel %vm285_vm4, %v1241_v54, %v1195_v47  ;;  %v1571_v47 = vld [vmem:[%s1929_s1 + $0x98] sm:$0xff]  ;;  %v1586_v54 = vld [vmem:[%s1929_s1 + $0x48] sm:$0xff] }
  0xa4   : > { %709 = vmatpush.msrb.mxu1 %v1186_v52  ;;  %579 = vmatpush.msrb.mxu2 %v310_v59  ;;  %v1581_v50 = vld [vmem:[%s1929_s1 + $0xf8] sm:$0xff]  ;;  %v1594_v59 = vld [vmem:[%s1929_s1 + $0xa8] sm:$0xff] }
  0xa5   : > { %1067 = vmatmul.msk.f32.gmra.mxu3 %vm397_vm2, %v1485_v60  ;;  %450 = vmatpush.msra.mxu0 %v288_v61 }
  0xa6   : > { %710 = vmatpush.msrb.mxu1 %v1191_v57  ;;  %580 = vmatpush.msrb.mxu2 %v289_v62 }
  0xa7   : > { %v1199_v7 = vpop.permute.xlu0 %1198  ;;  %451 = vmatpush.msra.mxu0 %v286_v63  ;;  %v365_v63 = vld [vmem:[%s1929_s1] sm:$0xff] }
  0xa8   : > { %711 = vmatpush.msrb.mxu1 %v1196_v53  ;;  %v1200_v9 = vunpack.i.l.bf16 %v1199_v7  ;;  %v1254_v10 = vpop.permute.xlu2 %1253  ;;  %v1204_v11 = vpop.permute.xlu1 %1203  ;;  %581 = vmatpush.msrb.mxu2 %v287_v3  ;;  %v1201_v13 = vunpack.i.h.bf16 %v1199_v7 }
  0xa9   : > { %v1256_v14 = vunpack.i.h.bf16 %v1254_v10  ;;  %v1255_v15 = vunpack.i.l.bf16 %v1254_v10  ;;  %v1205_v16 = vunpack.i.l.bf16 %v1204_v11  ;;  %v1206_v17 = vunpack.i.h.bf16 %v1204_v11 }
  0xaa   : > { %1057 = vmatmul.msk.f32.gmra.mxu2 %vm397_vm2, %v1498_v8  ;;  %712 = vmatpush.msrb.mxu1 %v1201_v13  ;;  %v266_v19 = vsel %vm262_vm5, %v1200_v9, %v1201_v13 }
  0xab   : > { %1046 = vmatmul.msk.f32.gmra.mxu1 %vm397_vm2, %v1503_v12  ;;  %v265_v21 = vsel %vm262_vm5, %v1255_v15, %v1200_v9  ;;  %582 = vmatpush.msrb.mxu2 %v266_v19  ;;  %v263_v22 = vsel %vm262_vm5, %v1256_v14, %v1205_v16  ;;  %v264_v23 = vsel %vm262_vm5, %v1205_v16, %v1206_v17  ;;  %v371_v19 = vld [vmem:[%s1929_s1 + $0x30] sm:$0xff] }
  0xac   : > { %452 = vmatpush.msra.mxu0 %v265_v21  ;;  %713 = vmatpush.msrb.mxu1 %v1206_v17  ;;  %v369_v17 = vld [vmem:[%s1929_s1 + $0x20] sm:$0xff] }
  0xad   : > { %1068 = vmatmul.msk.f32.gmra.mxu3 %vm397_vm2, %v1511_v20  ;;  %583 = vmatpush.msrb.mxu2 %v264_v23  ;;  %v377_v21 = vld [vmem:[%s1929_s1 + $0x60] sm:$0xff] }
  0xae   : > { %453 = vmatpush.msra.mxu0 %v263_v22  ;;  %v379_v22 = vld [vmem:[%s1929_s1 + $0x70] sm:$0xff]  ;;  %v381_v23 = vld [vmem:[%s1929_s1 + $0x80] sm:$0xff] }
  0xaf   : > { %v1520_v24 = vpop.permute.xlu0 %1213 }
  0xb0   : > { %v1215_v26 = vunpack.i.l.bf16 %v1520_v24  ;;  %v1528_v27 = vpop.permute.xlu1 %1218  ;;  %v1216_v29 = vunpack.i.h.bf16 %v1520_v24  ;;  %v383_v24 = vld [vmem:[%s1929_s1 + $0x90] sm:$0xff] }
  0xb1   : > { %v1220_v30 = vunpack.i.l.bf16 %v1528_v27  ;;  %v1221_v31 = vunpack.i.h.bf16 %v1528_v27  ;;  %v387_v27 = vld [vmem:[%s1929_s1 + $0xb0] sm:$0xff] }
  0xb2   : > { %1058 = vmatmul.msk.f32.gmra.mxu2 %vm397_vm2, %v1525_v25  ;;  %714 = vmatpush.msrb.mxu1 %v1216_v29  ;;  %v243_v32 = vsel %vm239_vm6, %v1215_v26, %v1216_v29 }
  0xb3   : > { %1047 = vmatmul.msk.f32.gmra.mxu1 %vm397_vm2, %v1533_v28  ;;  %584 = vmatpush.msrb.mxu2 %v243_v32  ;;  %v241_v34 = vsel %vm239_vm6, %v1220_v30, %v1221_v31  ;;  %v389_v32 = vld [vmem:[%s1929_s1 + $0xc0] sm:$0xff] }
  0xb4   : > { %715 = vmatpush.msrb.mxu1 %v1221_v31 }
  0xb5   : > { %1069 = vmatmul.msk.f32.gmra.mxu3 %vm397_vm2, %v1546_v33  ;;  %585 = vmatpush.msrb.mxu2 %v241_v34 }
  0xb7   : > { %v1229_v35 = vpop.permute.xlu0 %1228 }
  0xb8   : > { %v1230_v39 = vunpack.i.l.bf16 %v1229_v35  ;;  %v1234_v40 = vpop.permute.xlu1 %1233  ;;  %v1231_v42 = vunpack.i.h.bf16 %v1229_v35 }
  0xb9   : > { %v1235_v43 = vunpack.i.l.bf16 %v1234_v40  ;;  %v1236_v44 = vunpack.i.h.bf16 %v1234_v40 }
  0xba   : > { %1059 = vmatmul.msk.f32.gmra.mxu2 %vm397_vm2, %v1558_v38  ;;  %716 = vmatpush.msrb.mxu1 %v1231_v42  ;;  %v220_v45 = vsel %vm216_vm7, %v1230_v39, %v1231_v42 }
  0xbb   : > { %1048 = vmatmul.msk.f32.gmra.mxu1 %vm397_vm2, %v1563_v41  ;;  %586 = vmatpush.msrb.mxu2 %v220_v45  ;;  %v218_v48 = vsel %vm216_vm7, %v1235_v43, %v1236_v44 }
  0xbc   : > { %717 = vmatpush.msrb.mxu1 %v1236_v44 }
  0xbd   : > { %1070 = vmatmul.msk.f32.gmra.mxu3 %vm397_vm2, %v1571_v47  ;;  %587 = vmatpush.msrb.mxu2 %v218_v48 }
  0xbf   : > { %v1244_v49 = vpop.permute.xlu0 %1243 }
  0xc0   : > { %v1245_v52 = vunpack.i.l.bf16 %v1244_v49  ;;  %v1249_v53 = vpop.permute.xlu1 %1248  ;;  %v1246_v55 = vunpack.i.h.bf16 %v1244_v49 }
  0xc1   : > { %v1251_v56 = vunpack.i.h.bf16 %v1249_v53  ;;  %v1250_v57 = vunpack.i.l.bf16 %v1249_v53 }
  0xc2   : > { %1060 = vmatmul.msk.f32.gmra.mxu2 %vm397_vm2, %v1581_v50  ;;  %718 = vmatpush.msrb.mxu1 %v1246_v55  ;;  %v197_v58 = vsel %vm193_vm8, %v1245_v52, %v1246_v55 }
  0xc3   : > { %1049 = vmatmul.msk.f32.gmra.mxu1 %vm397_vm2, %v1586_v54  ;;  %588 = vmatpush.msrb.mxu2 %v197_v58  ;;  %v195_v61 = vsel %vm193_vm8, %v1250_v57, %v1251_v56 }
  0xc4   : > { %719 = vmatpush.msrb.mxu1 %v1251_v56 }
  0xc5   : > { %1071 = vmatmul.msk.f32.gmra.mxu3 %vm397_vm2, %v1594_v59  ;;  %589 = vmatpush.msrb.mxu2 %v195_v61 }
  0xc6   : > { %720 = vmatpush.msrb.mxu1 %v1421_v1 }
  0xc7   : > { %v1259_v62 = vpop.permute.xlu0 %1258  ;;  %590 = vmatpush.msrb.mxu2 %v1419_v0  ;;  %v1269_v0 = vpop.permute.xlu2 %1268 }
  0xc8   : > { %v1260_v3 = vunpack.i.l.bf16 %v1259_v62  ;;  %v1264_v7 = vpop.permute.xlu1 %1263  ;;  %721 = vmatpush.msrb.mxu1 %v1427_v4  ;;  %v1261_v9 = vunpack.i.h.bf16 %v1259_v62  ;;  %v1270_v4 = vunpack.i.l.bf16 %v1269_v0  ;;  %v1271_v14 = vunpack.i.h.bf16 %v1269_v0 }
  0xc9   : > { %591 = vmatpush.msrb.mxu2 %v1423_v2  ;;  %v1265_v1 = vunpack.i.l.bf16 %v1264_v7  ;;  %v1266_v11 = vunpack.i.h.bf16 %v1264_v7 }
  0xca   : > { %592 = vmatmul.f32.vlgmr.msrb.gmra.mxu2 %v365_v63  ;;  %v242_v10 = vsel %vm239_vm6, %v1260_v3, %v1215_v26  ;;  %v240_v2 = vsel %vm239_vm6, %v1261_v9, %v1220_v30  ;;  %v194_v16 = vsel %vm193_vm8, %v1271_v14, %v1250_v57  ;;  %v385_v26 = vld [vmem:[%s1929_s1 + $0xa0] sm:$0xff] }
  0xcb   : > { %1050 = vmatmul.msk.f32.gmra.mxu1 %vm397_vm2, %v1455_v37  ;;  %655 = vmatpush.msra.mxu2 %v1442_v18  ;;  %v219_v13 = vsel %vm216_vm7, %v1265_v1, %v1230_v39  ;;  %v367_v18 = vld [vmem:[%s1929_s1 + $0x10] sm:$0xff]  ;;  %v217_v15 = vsel %vm216_vm7, %v1266_v11, %v1235_v43 }
  0xcc   : > { %454 = vmatpush.msra.mxu0 %v242_v10 }
  0xcd   : > { %656 = vmatpush.msra.mxu2 %v1450_v36  ;;  %1072 = vmatmul.msk.f32.gmra.mxu3 %vm397_vm2, %v1469_v46  ;;  %v196_v36 = vsel %vm193_vm8, %v1270_v4, %v1245_v52 }
  0xce   : > { %455 = vmatpush.msra.mxu0 %v240_v2 }
  0xd0   : > { %456 = vmatpush.msra.mxu0 %v219_v13 }
  0xd2   : > { %457 = vmatpush.msra.mxu0 %v217_v15  ;;  %595 = vmatmul.f32.gmra.mxu2 %v367_v18 }
  0xd3   : > { %1051 = vmatmul.msk.f32.gmra.mxu1 %vm397_vm2, %v1485_v60 }
  0xd4   : > { %458 = vmatpush.msra.mxu0 %v196_v36 }
  0xd5   : > { %1073 = vmatmul.msk.f32.gmra.mxu3 %vm397_vm2, %v1498_v8 }
  0xd6   : > { %459 = vmatpush.msra.mxu0 %v194_v16 }
  0xd8   : > { %460 = vmatpush.msra.mxu0 %v1431_v6  ;;  %v375_v6 = vld [vmem:[%s1929_s1 + $0x50] sm:$0xff] }
  0xda   : > { %461 = vmatpush.msra.mxu0 %v1429_v5  ;;  %598 = vmatmul.f32.gmra.mxu2 %v369_v17  ;;  %v373_v5 = vld [vmem:[%s1929_s1 + $0x40] sm:$0xff] }
  0xdb   : > { %462 = vmatmul.f32.vlgmr.msra.gmra.mxu0 %v365_v63  ;;  %1052 = vmatmul.msk.f32.gmra.mxu1 %vm397_vm2, %v1511_v20 }
  0xdd   : > { %1074 = vmatmul.msk.f32.gmra.mxu3 %vm397_vm2, %v1525_v25 }
  0xe2   : > { %601 = vmatmul.f32.gmra.mxu2 %v371_v19 }
  0xe3   : > { %465 = vmatmul.f32.gmra.mxu0 %v367_v18  ;;  %1053 = vmatmul.msk.f32.gmra.mxu1 %vm397_vm2, %v1546_v33 }
  0xe5   : > { %1075 = vmatmul.msk.f32.gmra.mxu3 %vm397_vm2, %v1558_v38 }
  0xea   : > { %604 = vmatmul.f32.gmra.mxu2 %v373_v5 }
  0xeb   : > { %468 = vmatmul.f32.gmra.mxu0 %v369_v17  ;;  %1054 = vmatmul.msk.f32.gmra.mxu1 %vm397_vm2, %v1571_v47 }
  0xed   : > { %1076 = vmatmul.msk.f32.gmra.mxu3 %vm397_vm2, %v1581_v50 }
  0xf2   : > { %607 = vmatmul.f32.gmra.mxu2 %v375_v6 }
  0xf3   : > { %471 = vmatmul.f32.gmra.mxu0 %v371_v19  ;;  %1055 = vmatmul.msk.f32.gmra.mxu1 %vm397_vm2, %v1594_v59 }
  0xf5   : > { %1077 = vmatmul.msk.f32.vlgmr.msrb.gmra.mxu3 %vm397_vm2, %v1475_v51 }
  0xfa   : > { %610 = vmatmul.f32.gmra.mxu2 %v377_v21 }
  0xfb   : > { %474 = vmatmul.f32.gmra.mxu0 %v373_v5  ;;  %722 = vmatmul.f32.vlgmr.msrb.gmra.mxu1 %v365_v63 }
  0xfd   : > { %1078 = vmatmul.msk.f32.gmra.mxu3 %vm397_vm2, %v1503_v12 }
 0x102   : > { %613 = vmatmul.f32.gmra.mxu2 %v379_v22 }
 0x103   : > { %477 = vmatmul.f32.gmra.mxu0 %v375_v6  ;;  %725 = vmatmul.f32.gmra.mxu1 %v367_v18 }
 0x105   : > { %1079 = vmatmul.msk.f32.gmra.mxu3 %vm397_vm2, %v1533_v28 }
 0x10a   : > { %616 = vmatmul.f32.gmra.mxu2 %v381_v23 }
 0x10b   : > { %480 = vmatmul.f32.gmra.mxu0 %v377_v21  ;;  %728 = vmatmul.f32.gmra.mxu1 %v369_v17 }
 0x10d   : > { %1080 = vmatmul.msk.f32.gmra.mxu3 %vm397_vm2, %v1563_v41 }
 0x112   : > { %619 = vmatmul.f32.gmra.mxu2 %v383_v24 }
 0x113   : > { %483 = vmatmul.f32.gmra.mxu0 %v379_v22  ;;  %731 = vmatmul.f32.gmra.mxu1 %v371_v19 }
 0x115   : > { %1081 = vmatmul.msk.f32.gmra.mxu3 %vm397_vm2, %v1586_v54 }
 0x11a   : > { %622 = vmatmul.f32.gmra.mxu2 %v385_v26 }
 0x11b   : > { %486 = vmatmul.f32.gmra.mxu0 %v381_v23  ;;  %734 = vmatmul.f32.gmra.mxu1 %v373_v5 }
 0x11d   : > { %1082 = vmatmul.msk.f32.gmra.mxu3 %vm397_vm2, %v1455_v37 }
 0x120   : > { %v528_v29 = vpop.f32.mrf.mxu1  ;;  %v1689_v30 = vpop.f32.mrf.mxu3 }
 0x122   : > { %625 = vmatmul.f32.gmra.mxu2 %v387_v27 }
 0x123   : > { %489 = vmatmul.f32.gmra.mxu0 %v383_v24  ;;  %737 = vmatmul.f32.gmra.mxu1 %v375_v6 }
 0x125   : > { %1083 = vmatmul.msk.f32.gmra.mxu3 %vm397_vm2, %v1485_v60  ;;  %v1693_v31 = vpop.f32.mrf.mxu2  ;;  %v391_v60 = vld [vmem:[%s1929_s1 + $0xd0] sm:$0xff] }
 0x128   : > { %v531_v37 = vpop.f32.mrf.mxu1  ;;  %v1698_v34 = vpop.f32.mrf.mxu3 }
 0x12a   : > { %628 = vmatmul.f32.gmra.mxu2 %v389_v32 }
 0x12b   : > { %492 = vmatmul.f32.gmra.mxu0 %v385_v26  ;;  %740 = vmatmul.f32.gmra.mxu1 %v377_v21 }
 0x12d   : > { %1084 = vmatmul.msk.f32.gmra.mxu3 %vm397_vm2, %v1511_v20  ;;  %v1702_v35 = vpop.f32.mrf.mxu2  ;;  %v393_v20 = vld [vmem:[%s1929_s1 + $0xe0] sm:$0xff] }
 0x130   : > { %v534_v39 = vpop.f32.mrf.mxu1  ;;  %v1707_v40 = vpop.f32.mrf.mxu3 }
 0x132   : > { %631 = vmatmul.f32.gmra.mxu2 %v391_v60 }
 0x133   : > { %495 = vmatmul.f32.gmra.mxu0 %v387_v27  ;;  %743 = vmatmul.f32.gmra.mxu1 %v379_v22 }
 0x135   : > { %1085 = vmatmul.msk.f32.gmra.mxu3 %vm397_vm2, %v1546_v33  ;;  %v1711_v42 = vpop.f32.mrf.mxu2  ;;  %v395_v33 = vld [vmem:[%s1929_s1 + $0xf0] sm:$0xff] }
 0x138   : > { %v537_v43 = vpop.f32.mrf.mxu1  ;;  %v1716_v44 = vpop.f32.mrf.mxu3 }
 0x13a   : > { %634 = vmatmul.f32.gmra.mxu2 %v393_v20 }
 0x13b   : > { %498 = vmatmul.f32.gmra.mxu0 %v389_v32  ;;  %746 = vmatmul.f32.gmra.mxu1 %v381_v23 }
 0x13d   : > { %1086 = vmatmul.msk.f32.gmra.mxu3 %vm397_vm2, %v1571_v47  ;;  %v1720_v45 = vpop.f32.mrf.mxu2 }
 0x140   : > { %v540_v48 = vpop.f32.mrf.mxu1  ;;  %v1725_v49 = vpop.f32.mrf.mxu3 }
 0x142   : > { %637 = vmatmul.f32.gmra.mxu2 %v395_v33 }
 0x143   : > { %501 = vmatmul.f32.gmra.mxu0 %v391_v60  ;;  %749 = vmatmul.f32.gmra.mxu1 %v383_v24 }
 0x145   : > { %1087 = vmatmul.msk.f32.gmra.mxu3 %vm397_vm2, %v1594_v59  ;;  %v1729_v52 = vpop.f32.mrf.mxu2 }
 0x148   : > { %v543_v53 = vpop.f32.mrf.mxu1  ;;  %v1731_v55 = vpop.f32.mrf.mxu3 }
 0x14a   : > { %1061 = vmatmul.msk.f32.vlgmr.msra.gmra.mxu2 %vm397_vm2, %v1475_v51 }
 0x14b   : > { %504 = vmatmul.f32.gmra.mxu0 %v393_v20  ;;  %752 = vmatmul.f32.gmra.mxu1 %v385_v26 }
 0x14d   : > { %1088 = vmatmul.msk.f32.gmra.mxu3 %vm397_vm2, %v1469_v46  ;;  %v1737_v47 = vpop.f32.mrf.mxu2 }
 0x150   : > { %v546_v56 = vpop.f32.mrf.mxu1  ;;  %v1739_v57 = vpop.f32.mrf.mxu3 }
 0x152   : > { %1062 = vmatmul.msk.f32.gmra.mxu2 %vm397_vm2, %v1503_v12 }
 0x153   : > { %507 = vmatmul.f32.gmra.mxu0 %v395_v33  ;;  %755 = vmatmul.f32.gmra.mxu1 %v387_v27 }
 0x155   : > { %1089 = vmatmul.msk.f32.gmra.mxu3 %vm397_vm2, %v1498_v8  ;;  %v1745_v58 = vpop.f32.mrf.mxu2 }
 0x158   : > { %v463_v51 = vpop.f32.mrf.mxu0  ;;  %v549_v59 = vpop.f32.mrf.mxu1 }
 0x159   : > { %v1747_v61 = vadd.f32 %v528_v29, %v463_v51  ;;  %v1749_v46 = vpop.f32.mrf.mxu3 }
 0x15a   : > { %1063 = vmatmul.msk.f32.gmra.mxu2 %vm397_vm2, %v1533_v28 }
 0x15b   : > { %758 = vmatmul.f32.gmra.mxu1 %v389_v32 }
 0x15d   : > { %1090 = vmatmul.msk.f32.gmra.mxu3 %vm397_vm2, %v1525_v25  ;;  %v1755_v12 = vpop.f32.mrf.mxu2 }
 0x160   : > { %v466_v62 = vpop.f32.mrf.mxu0  ;;  %v552_v63 = vpop.f32.mrf.mxu1 }
 0x161   : > { %v1757_v8 = vadd.f32 %v531_v37, %v466_v62  ;;  %v1759_v3 = vpop.f32.mrf.mxu3 }
 0x162   : > { %1064 = vmatmul.msk.f32.gmra.mxu2 %vm397_vm2, %v1563_v41 }
 0x163   : > { %761 = vmatmul.f32.gmra.mxu1 %v391_v60 }
 0x165   : > { %1091 = vmatmul.msk.f32.gmra.mxu3 %vm397_vm2, %v1558_v38  ;;  %v1765_v28 = vpop.f32.mrf.mxu2 }
 0x168   : > { %v469_v7 = vpop.f32.mrf.mxu0  ;;  %v1767_v9 = vpop.f32.mrf.mxu1 }
 0x169   : > { %v1769_v25 = vadd.f32 %v534_v39, %v469_v7  ;;  %v1771_v10 = vpop.f32.mrf.mxu3 }
 0x16a   : > { %1065 = vmatmul.msk.f32.gmra.mxu2 %vm397_vm2, %v1586_v54 }
 0x16b   : > { %764 = vmatmul.f32.gmra.mxu1 %v393_v20 }
 0x16d   : > { %1092 = vmatmul.msk.f32.gmra.mxu3 %vm397_vm2, %v1581_v50  ;;  %v1777_v41 = vpop.f32.mrf.mxu2 }
 0x170   : > { %v472_v1 = vpop.f32.mrf.mxu0  ;;  %v1779_v38 = vpop.f32.mrf.mxu1 }
 0x171   : > { %v1781_v0 = vadd.f32 %v537_v43, %v472_v1  ;;  %v703_v11 = vpop.f32.mrf.mxu3 }
 0x173   : > { %767 = vmatmul.f32.gmra.mxu1 %v395_v33 }
 0x175   : > { %v1783_v2 = vpop.f32.mrf.mxu2 }
 0x178   : > { %v475_v4 = vpop.f32.mrf.mxu0  ;;  %v723_v13 = vpop.f32.mrf.mxu1 }
 0x179   : > { %v1785_v18 = vadd.f32 %v540_v48, %v475_v4  ;;  %v788_v54 = vpop.f32.mrf.mxu3 }
 0x17a   : > { %v1787_v14 = vadd.f32 %v788_v54, %v723_v13 }
 0x17c   : > { %1934 = vst [vmem:[#allocation5_spill] sm:$0xff] %v1787_v14 }
 0x17d   : > { %v1789_v15 = vpop.f32.mrf.mxu2 }
 0x180   : > { %v478_v50 = vpop.f32.mrf.mxu0  ;;  %v726_v36 = vpop.f32.mrf.mxu1 }
 0x181   : > { %v1791_v16 = vadd.f32 %v543_v53, %v478_v50  ;;  %v791_v17 = vpop.f32.mrf.mxu3 }
 0x182   : > { %v1793_v19 = vadd.f32 %v791_v17, %v726_v36 }
 0x184   : > { %1935 = vst [vmem:[#allocation6_spill] sm:$0xff] %v1793_v19 }
 0x185   : > { %v1795_v5 = vpop.f32.mrf.mxu2 }
 0x188   : > { %v481_v6 = vpop.f32.mrf.mxu0  ;;  %v729_v21 = vpop.f32.mrf.mxu1 }
 0x189   : > { %v1797_v22 = vadd.f32 %v546_v56, %v481_v6  ;;  %v794_v23 = vpop.f32.mrf.mxu3 }
 0x18a   : > { %v1799_v24 = vadd.f32 %v794_v23, %v729_v21 }
 0x18c   : > { %1936 = vst [vmem:[#allocation7_spill] sm:$0xff] %v1799_v24 }
 0x18d   : > { %v617_v26 = vpop.f32.mrf.mxu2 }
 0x190   : > { %v484_v27 = vpop.f32.mrf.mxu0  ;;  %v732_v29 = vpop.f32.mrf.mxu1 }
 0x191   : > { %v1801_v32 = vadd.f32 %v549_v59, %v484_v27  ;;  %v797_v37 = vpop.f32.mrf.mxu3 }
 0x192   : > { %v1803_v60 = vadd.f32 %v797_v37, %v732_v29 }
 0x194   : > { %1937 = vst [vmem:[#allocation8_spill] sm:$0xff] %v1803_v60 }
 0x195   : > { %v620_v39 = vpop.f32.mrf.mxu2 }
 0x198   : > { %v487_v20 = vpop.f32.mrf.mxu0  ;;  %v735_v43 = vpop.f32.mrf.mxu1 }
 0x199   : > { %v1805_v33 = vadd.f32 %v552_v63, %v487_v20  ;;  %v800_v48 = vpop.f32.mrf.mxu3 }
 0x19a   : > { %v1807_v53 = vadd.f32 %v800_v48, %v735_v43 }
 0x19c   : > { %1938 = vst [vmem:[#allocation9_spill] sm:$0xff] %v1807_v53 }
 0x19d   : > { %v623_v56 = vpop.f32.mrf.mxu2 }
 0x1a0   : > { %v1809_v51 = vpop.f32.mrf.mxu0  ;;  %v738_v62 = vpop.f32.mrf.mxu1 }
 0x1a1   : > { %v803_v7 = vpop.f32.mrf.mxu3 }
 0x1a2   : > { %v1811_v1 = vadd.f32 %v803_v7, %v738_v62 }
 0x1a4   : > { %1939 = vst [vmem:[#allocation10_spill] sm:$0xff] %v1811_v1 }
 0x1a5   : > { %v626_v59 = vpop.f32.mrf.mxu2 }
 0x1a6   : > { %v692_v53 = vadd.f32 %v1739_v57, %v626_v59 }
 0x1a8   : > { %v1813_v4 = vpop.f32.mrf.mxu0  ;;  %v741_v13 = vpop.f32.mrf.mxu1 }
 0x1a9   : > { %v806_v54 = vpop.f32.mrf.mxu3 }
 0x1aa   : > { %v1815_v50 = vadd.f32 %v806_v54, %v741_v13 }
 0x1ac   : > { %1940 = vst [vmem:[#allocation11_spill] sm:$0xff] %v1815_v50 }
 0x1ad   : > { %v629_v36 = vpop.f32.mrf.mxu2 }
 0x1b0   : > { %v496_v63 = vpop.f32.mrf.mxu0  ;;  %v744_v17 = vpop.f32.mrf.mxu1 }
 0x1b1   : > { %v809_v6 = vpop.f32.mrf.mxu3 }
 0x1b2   : > { %v1817_v21 = vadd.f32 %v809_v6, %v744_v17 }
 0x1b5   : > { %v632_v23 = vpop.f32.mrf.mxu2 }
 0x1b6   : > { %v698_v19 = vadd.f32 %v1759_v3, %v632_v23  ;;  %v686_v3 = vadd.f32 %v1725_v49, %v620_v39  ;;  %v680_v49 = vadd.f32 %v1707_v40, %v1795_v5 }
 0x1b8   : > { %v499_v27 = vpop.f32.mrf.mxu0  ;;  %v747_v29 = vpop.f32.mrf.mxu1  ;;  %v876_v1 = vmax.f32 %v698_v19, 0.0  ;;  %v683_v19 = vadd.f32 %v1716_v44, %v617_v26  ;;  %v864_v39 = vmax.f32 %v686_v3, 0.0  ;;  %v562_v44 = vadd.f32 %v1693_v31, %v496_v63 }
 0x1b9   : > { %v812_v37 = vpop.f32.mrf.mxu3  ;;  %v858_v40 = vmax.f32 %v680_v49, 0.0  ;;  %v556_v31 = vadd.f32 %v1767_v9, %v1809_v51  ;;  %v854_v9 = vmax.f32 %v1797_v22, 0.0  ;;  %v845_v3 = vmax.f32 %v1781_v0, 0.0 }
 0x1ba   : > { %v1819_v20 = vadd.f32 %v812_v37, %v747_v29  ;;  %v695_v29 = vadd.f32 %v1749_v46, %v629_v36 }
 0x1bd   : > { %v635_v43 = vpop.f32.mrf.mxu2 }
 0x1be   : > { %v701_v54 = vadd.f32 %v1771_v10, %v635_v43  ;;  %v689_v10 = vadd.f32 %v1731_v55, %v623_v56 }
 0x1c0   : > { %v502_v48 = vpop.f32.mrf.mxu0  ;;  %v1821_v62 = vpop.f32.mrf.mxu1  ;;  %v879_v37 = vmax.f32 %v701_v54, 0.0  ;;  %v867_v59 = vmax.f32 %v689_v10, 0.0  ;;  %v863_v54 = vmax.f32 %v556_v31, 0.0  ;;  %v848_v10 = vmax.f32 %v1785_v18, 0.0 }
 0x1c1   : > { %v1823_v7 = vpop.f32.mrf.mxu3  ;;  %v568_v55 = vadd.f32 %v1711_v42, %v502_v48  ;;  %v674_v42 = vadd.f32 %v1689_v30, %v1783_v2 }
 0x1c3   : > { %v875_v26 = vmax.f32 %v568_v55, 0.0  ;;  %v852_v63 = vmax.f32 %v674_v42, 0.0  ;;  %v1942_v42 = vld [vmem:[#allocation10_spill] sm:$0xff] }
 0x1c5   : > { %v638_v13 = vpop.f32.mrf.mxu2 }
 0x1c6   : > { %v704_v14 = vadd.f32 %v703_v11, %v638_v13  ;;  %v873_v11 = vmax.f32 %v695_v29, 0.0  ;;  %v861_v13 = vmax.f32 %v683_v19, 0.0  ;;  %v851_v29 = vmax.f32 %v1791_v16, 0.0 }
 0x1c8   : > { %v882_v17 = vmax.f32 %v704_v14, 0.0  ;;  %v505_v6 = vpop.f32.mrf.mxu0  ;;  %v1827_v24 = vpop.f32.mrf.mxu1  ;;  %v870_v14 = vmax.f32 %v692_v53, 0.0  ;;  %v565_v53 = vadd.f32 %v1702_v35, %v499_v27  ;;  %v559_v35 = vadd.f32 %v1779_v38, %v1813_v4 }
 0x1c9   : > { %v1829_v60 = vpop.f32.mrf.mxu3  ;;  %v571_v46 = vadd.f32 %v1720_v45, %v505_v6  ;;  %v860_v38 = vmax.f32 %v1805_v33, 0.0  ;;  %v857_v6 = vmax.f32 %v1801_v32, 0.0  ;;  %v842_v33 = vmax.f32 %v1769_v25, 0.0  ;;  %v884_v25 = vld [vmem:[%s1930_s2] sm:$0xff] }
 0x1ca   : > { %909 = vmatpush.msrb.mxu2 %v882_v17  ;;  %v872_v27 = vmax.f32 %v565_v53, 0.0  ;;  %v866_v30 = vmax.f32 %v559_v35, 0.0 }
 0x1cc   : > { %910 = vmatpush.msrb.mxu2 %v879_v37 }
 0x1cd   : > { %v1833_v50 = vpop.f32.mrf.mxu2 }
 0x1ce   : > { %911 = vmatpush.msrb.mxu2 %v876_v1  ;;  %v878_v1 = vmax.f32 %v571_v46, 0.0 }
 0x1d0   : > { %v508_v23 = vpop.f32.mrf.mxu0  ;;  %v1837_v43 = vpop.f32.mrf.mxu1  ;;  %912 = vmatpush.msrb.mxu2 %v873_v11 }
 0x1d1   : > { %v574_v36 = vadd.f32 %v1729_v52, %v508_v23  ;;  %v1841_v57 = vpop.f32.mrf.mxu3  ;;  %v677_v52 = vadd.f32 %v1698_v34, %v1789_v15  ;;  %v869_v15 = vmax.f32 %v562_v44, 0.0  ;;  %v839_v23 = vmax.f32 %v1757_v8, 0.0  ;;  %v1941_v44 = vld [vmem:[#allocation11_spill] sm:$0xff] }
 0x1d2   : > { %913 = vmatpush.msrb.mxu2 %v870_v14  ;;  %v822_v53 = vadd.f32 %v1841_v57, %v1837_v43 }
 0x1d3   : > { %v881_v56 = vmax.f32 %v574_v36, 0.0  ;;  %v855_v34 = vmax.f32 %v677_v52, 0.0  ;;  %v836_v36 = vmax.f32 %v1747_v61, 0.0  ;;  %v816_v52 = vadd.f32 %v1823_v7, %v1821_v62  ;;  %v1943_v7 = vld [vmem:[#allocation9_spill] sm:$0xff] }
 0x1d4   : > { %914 = vmatpush.msrb.mxu2 %v867_v59  ;;  %v853_v62 = vmax.f32 %v1942_v42, 0.0 }
 0x1d5   : > { %886 = vmatpush.msrb.mxu0 %v881_v56  ;;  %v661_v45 = vpop.f32.mrf.mxu2  ;;  %v865_v57 = vmax.f32 %v816_v52, 0.0 }
 0x1d6   : > { %915 = vmatpush.msrb.mxu2 %v864_v39  ;;  %v662_v0 = vadd.f32 %v661_v45, %v1745_v58  ;;  %v885_v45 = vld [vmem:[%s1930_s2 + $0x8] sm:$0xff] }
 0x1d7   : > { %887 = vmatpush.msrb.mxu0 %v878_v1 }
 0x1d8   : > { %v1853_v5 = vpop.f32.mrf.mxu1  ;;  %916 = vmatpush.msrb.mxu2 %v861_v13  ;;  %v840_v61 = vmax.f32 %v662_v0, 0.0  ;;  %v871_v13 = vmax.f32 %v822_v53, 0.0 }
 0x1d9   : > { %v824_v48 = vpop.f32.mrf.mxu3  ;;  %888 = vmatpush.msrb.mxu0 %v875_v26  ;;  %v856_v26 = vmax.f32 %v1941_v44, 0.0 }
 0x1da   : > { %917 = vmatpush.msrb.mxu2 %v858_v40  ;;  %v825_v49 = vadd.f32 %v824_v48, %v1853_v5  ;;  %v850_v40 = vmax.f32 %v1943_v7, 0.0  ;;  %v1944_v5 = vld [vmem:[#allocation8_spill] sm:$0xff]  ;;  %v1946_v48 = vld [vmem:[#allocation6_spill] sm:$0xff] }
 0x1db   : > { %889 = vmatpush.msrb.mxu0 %v872_v27  ;;  %v847_v35 = vmax.f32 %v1944_v5, 0.0  ;;  %v1945_v27 = vld [vmem:[#allocation7_spill] sm:$0xff] }
 0x1dc   : > { %918 = vmatpush.msrb.mxu2 %v855_v34  ;;  %v841_v34 = vmax.f32 %v1946_v48, 0.0 }
 0x1dd   : > { %890 = vmatpush.msrb.mxu0 %v869_v15  ;;  %v664_v2 = vpop.f32.mrf.mxu2 }
 0x1de   : > { %919 = vmatpush.msrb.mxu2 %v852_v63  ;;  %v665_v16 = vadd.f32 %v664_v2, %v1755_v12  ;;  %v659_v12 = vadd.f32 %v1833_v50, %v1737_v47  ;;  %v819_v47 = vadd.f32 %v1829_v60, %v1827_v24  ;;  %v874_v50 = vmax.f32 %v825_v49, 0.0 }
 0x1df   : > { %891 = vmatpush.msrb.mxu0 %v866_v30  ;;  %v862_v24 = vmax.f32 %v1819_v20, 0.0  ;;  %v859_v60 = vmax.f32 %v1817_v21, 0.0  ;;  %v844_v20 = vmax.f32 %v1945_v27, 0.0  ;;  %v1947_v21 = vld [vmem:[#allocation5_spill] sm:$0xff] }
 0x1e0   : > { %v762_v17 = vpop.f32.mrf.mxu1  ;;  %v843_v8 = vmax.f32 %v665_v16, 0.0  ;;  %v837_v58 = vmax.f32 %v659_v12, 0.0  ;;  %v868_v43 = vmax.f32 %v819_v47, 0.0  ;;  %v838_v31 = vmax.f32 %v1947_v21, 0.0 }
 0x1e1   : > { %v827_v4 = vpop.f32.mrf.mxu3  ;;  %892 = vmatpush.msrb.mxu0 %v863_v54 }
 0x1e2   : > { %v828_v55 = vadd.f32 %v827_v4, %v762_v17 }
 0x1e3   : > { %893 = vmatpush.msrb.mxu0 %v860_v38 }
 0x1e4   : > { %v877_v1 = vmax.f32 %v828_v55, 0.0 }
 0x1e5   : > { %894 = vmatpush.msrb.mxu0 %v857_v6  ;;  %v667_v51 = vpop.f32.mrf.mxu2 }
 0x1e6   : > { %v668_v14 = vadd.f32 %v667_v51, %v1765_v28 }
 0x1e7   : > { %895 = vmatpush.msrb.mxu0 %v854_v9 }
 0x1e8   : > { %v765_v37 = vpop.f32.mrf.mxu1  ;;  %v846_v28 = vmax.f32 %v668_v14, 0.0 }
 0x1e9   : > { %v830_v11 = vpop.f32.mrf.mxu3  ;;  %896 = vmatpush.msrb.mxu0 %v851_v29 }
 0x1ea   : > { %v831_v59 = vadd.f32 %v830_v11, %v765_v37 }
 0x1eb   : > { %897 = vmatpush.msrb.mxu0 %v848_v10 }
 0x1ec   : > { %v880_v39 = vmax.f32 %v831_v59, 0.0 }
 0x1ed   : > { %898 = vmatpush.msrb.mxu0 %v845_v3  ;;  %v670_v32 = vpop.f32.mrf.mxu2 }
 0x1ee   : > { %v671_v22 = vadd.f32 %v670_v32, %v1777_v41 }
 0x1ef   : > { %899 = vmatpush.msrb.mxu0 %v842_v33 }
 0x1f0   : > { %v849_v46 = vmax.f32 %v671_v22, 0.0  ;;  %v768_v18 = vpop.f32.mrf.mxu1 }
 0x1f1   : > { %v833_v19 = vpop.f32.mrf.mxu3  ;;  %900 = vmatpush.msrb.mxu0 %v839_v23 }
 0x1f2   : > { %v834_v41 = vadd.f32 %v833_v19, %v768_v18  ;;  %920 = vmatpush.msrb.mxu2 %v849_v46 }
 0x1f3   : > { %901 = vmatpush.msrb.mxu0 %v836_v36 }
 0x1f4   : > { %v883_v56 = vmax.f32 %v834_v41, 0.0  ;;  %921 = vmatpush.msrb.mxu2 %v846_v28  ;;  %902 = vmatmul.f32.vlgmr.msrb.gmra.mxu0 %v884_v25 }
 0x1f6   : > { %932 = vmatpush.msra.mxu0 %v883_v56  ;;  %922 = vmatpush.msrb.mxu2 %v843_v8 }
 0x1f8   : > { %933 = vmatpush.msra.mxu0 %v880_v39  ;;  %923 = vmatpush.msrb.mxu2 %v840_v61 }
 0x1fa   : > { %934 = vmatpush.msra.mxu0 %v877_v1  ;;  %924 = vmatpush.msrb.mxu2 %v837_v58 }
 0x1fb   : > { %925 = vmatmul.f32.vlgmr.msrb.gmra.mxu2 %v884_v25 }
 0x1fc   : > { %935 = vmatpush.msra.mxu0 %v874_v50 }
 0x1fd   : > { %905 = vmatmul.f32.gmra.mxu0 %v885_v45 }
 0x1fe   : > { %936 = vmatpush.msra.mxu0 %v871_v13 }
 0x200   : > { %937 = vmatpush.msra.mxu0 %v868_v43 }
 0x202   : > { %938 = vmatpush.msra.mxu0 %v865_v57 }
 0x203   : > { %928 = vmatmul.f32.gmra.mxu2 %v885_v45 }
 0x204   : > { %939 = vmatpush.msra.mxu0 %v862_v24 }
 0x206   : > { %940 = vmatpush.msra.mxu0 %v859_v60 }
 0x208   : > { %941 = vmatpush.msra.mxu0 %v856_v26 }
 0x20a   : > { %942 = vmatpush.msra.mxu0 %v853_v62 }
 0x20c   : > { %943 = vmatpush.msra.mxu0 %v850_v40 }
 0x20e   : > { %944 = vmatpush.msra.mxu0 %v847_v35 }
 0x210   : > { %945 = vmatpush.msra.mxu0 %v844_v20 }
 0x212   : > { %946 = vmatpush.msra.mxu0 %v841_v34 }
 0x214   : > { %947 = vmatpush.msra.mxu0 %v838_v31 }
 0x215   : > { %948 = vmatmul.f32.vlgmr.msra.gmra.mxu0 %v884_v25 }
 0x21d   : > { %951 = vmatmul.f32.gmra.mxu0 %v885_v45 }
 0x271   : > { %v903_v15 = vpop.f32.mrf.mxu0 }
 0x272   : > { %955 = vst [vmem:[%s163_s8] sm:$0xff] %v903_v15 }
 0x27a   : > { %v906_v63 = vpop.f32.mrf.mxu0 }
 0x27b   : > { %959 = vst [vmem:[%s163_s8 + $0x18] sm:$0xff] %v906_v63 }
 0x27e   : > { %v926_v30 = vpop.f32.mrf.mxu2 }
 0x27f   : > { %956 = vst [vmem:[%s163_s8 + $0x8] sm:$0xff] %v926_v30 }
 0x286   : > { %v929_v2 = vpop.f32.mrf.mxu2 }
 0x287   : > { %960 = vst [vmem:[%s163_s8 + $0x20] sm:$0xff] %v929_v2 }
 0x292   : > { %v949_v54 = vpop.f32.mrf.mxu0 }
 0x293   : > { %958 = vst.msk [vmem:[%s163_s8 + $0x10] sm:$0xff] %vm957_vm9, %v949_v54 }
 0x29a   : > { %v952_v17 = vpop.f32.mrf.mxu0 }
 0x29b   : > { %961 = vst.msk [vmem:[%s163_s8 + $0x28] sm:$0xff] %vm957_vm9, %v952_v17 }
 0x29c   : > { %1299 = shalt.err (!%p1296_p3)
}
 0x29d   : > { %s1344_s4 = smov 384   ;;  %s1345_s5 = smov 24  }
 0x29e   : > { %1103 = dma.vmem_to_hbm [thread:$0]  (%p1404_p5), %s976_s19, 768, %s978_s20, %s963_s24, %s1344_s4, %s1344_s4, %s1345_s5  }
 0x29f PF: > { %p1109_p4 = scmp.ge.s32.totalorder %s1334_s15, 2  ;;  %s992_s6 = sand.u32 1, %s1322_s12  }
 0x2a0   : > { %s993_s7 = scalar_lea.sflag [#allocation3], %s992_s6 }
 0x2a1   : > { %p1106_p7 = pnand %p1109_p4, %p1408_p6 }
 0x2a3   : > { %p1107_p8 = pneg %p1106_p7 }
 0x2a5   : > { %1317 = dma.done.wait (%p1107_p8), %s993_s7, 768  }
 0x2a6   : > { %1319 = vsyncadd (%p1107_p8), %s993_s7, 4294966528  ;;  %p13_p9 = scmp.ge.s32.totalorder %s1391_s18, 4   ;;  %s1948_s12 = smov %s1326_s13 }
 0x2a7   : > { %s1949_s13 = smov %s1330_s14  ;;  %s1950_s14 = smov %s1402_s21 }
 0x2a8   : > { %s1951_s15 = smov %s1391_s18  ;;  %15 = sbr.rel (!%p13_p9) target bundleno = 3 (0x3), region = 67 }
 0x2ad   :  { %999 = vsyncpa [#allocation3], 1 }
 0x2ae   :  { %1001 = vsyncpa [#allocation3 + $0x1], 1 }

</bundles_post_ra>
